<compile_context>
chip_gen: v6e
topology: v6e:2x2x1
jax: 0.10.0
libtpu: 0.0.40
codegen_flags: <defaults>
</compile_context>

<pallas_src>
import math

import jax
import jax.numpy as jnp
from jax import lax
from jax.experimental import pallas as pl
from jax.experimental.pallas import tpu as pltpu

EMBEDDING_DIM = 32
NUM_CLASSES = 400           # C2D-R50 Kinetics-400 head width
VMEM_BUDGET = 24 * 2**20    # x double-buffer + accumulator budget (v7x-safe)
VMEM_LIMIT = 32 * 2**20     # scoped VMEM limit handed to Mosaic
LANE_MAX = 512              # inner accumulation chunk width (multiple of 128)


def _largest_divisor_leq(n, cap):
    cap = max(1, min(n, cap))
    for d in range(cap, 0, -1):
        if n % d == 0:
            return d
    return 1


def _make_kernel(*, hw, hw_tile, lane, b_tile, tc, ragged):
    n_chunks = hw_tile // lane
    inv_sqrt2 = 1.0 / math.sqrt(2.0)

    def kernel(x_ref, w_ref, b_ref, o_ref, acc_ref):
        # x_ref:   (b_tile, T*C, hw_tile)  streamed tile of the un-transposed video
        # w_ref:   (T*C, D)    fused weight: tile_T(w_net @ w_proj) / (T*H*W)
        # b_ref:   (1, D)      fused bias:   b_net @ w_proj + b_proj
        # o_ref:   (b_tile, 1, D)           output embeddings for this batch block
        # acc_ref: (b_tile, T*C, lane)      lane-wide running spatial sums (f32)
        k = pl.program_id(1)

        @pl.when(k == 0)
        def _():
            acc_ref[...] = jnp.zeros_like(acc_ref)

        base = k * hw_tile
        if ragged:
            # hoisted once; compares against the number of still-valid lanes
            lane_ids = lax.broadcasted_iota(jnp.int32, (b_tile, tc, lane), 2)

        def add_chunk(c, carry):
            start = c * lane
            if not isinstance(start, int):
                start = pl.multiple_of(start, lane)
            chunk = x_ref[:, :, pl.ds(start, lane)].astype(jnp.float32)
            if ragged:
                valid = hw - (base + c * lane)      # lanes of this chunk inside H*W
                chunk = jnp.where(lane_ids < valid, chunk, 0.0)
            acc_ref[...] += chunk                   # pure VALU, hidden under DMA
            return carry

        if n_chunks == 1:
            add_chunk(0, 0)
        else:
            lax.fori_loop(0, n_chunks, add_chunk, 0,
                          unroll=True if n_chunks <= 8 else 8)

        # Finalize: single cross-lane reduce, fused (mean-pool -> backbone head ->
        # video_proj) contraction, exact erf GELU.
        @pl.when(k == pl.num_programs(1) - 1)
        def _():
            sums = jnp.sum(acc_ref[...], axis=-1)                     # (b_tile, T*C)
            proj = jnp.dot(sums, w_ref[...],
                           preferred_element_type=jnp.float32) + b_ref[...]
            gelu = 0.5 * proj * (1.0 + lax.erf(proj * inv_sqrt2))     # nn.GELU()
            o_ref[...] = gelu.reshape(b_tile, 1, -1).astype(o_ref.dtype)

    return kernel


def c2d50_encoder(item_content, w_net, b_net, w_proj, b_proj):
    """item_content: (B, T, C, H, W) -> (B, embedding_dim) float32."""
    B, T, C, H, W = item_content.shape
    D = w_proj.shape[1]
    HW = H * W
    TC = T * C

    # ---- fold stand-in backbone head + video_proj + mean scale into one linear ----
    # mean_pool(x) @ w_net @ w_proj + (b_net @ w_proj + b_proj); the 1/(T*H*W) mean
    # scale and the sum over T are folded into the (T*C, D) weight rows.
    w_fused = jnp.dot(w_net.astype(jnp.float32), w_proj.astype(jnp.float32))   # (C,D)
    w_big = jnp.tile(w_fused, (T, 1)) * (1.0 / float(T * HW))                  # (TC,D)
    b_fused = (jnp.dot(b_net.astype(jnp.float32), w_proj.astype(jnp.float32))
               + b_proj.astype(jnp.float32)).reshape(1, D)                     # (1,D)

    # Contiguous reshape (free) of the ORIGINAL layout: no transpose, no pad.
    x = item_content.reshape(B, TC, HW)
    itemsize = x.dtype.itemsize

    # ---- tile selection: multi-MiB steps, sized against v7x's 64 MiB VMEM ----
    if HW >= 128:
        hw_cap = (HW // 128) * 128                            # lane-aligned, <= HW
        hw_fit = (VMEM_BUDGET - TC * LANE_MAX * 4) // (2 * TC * itemsize)
        hw_fit = max(128, (hw_fit // 128) * 128)
        hw_tile = min(hw_cap, hw_fit)
    else:
        hw_tile = HW                                          # tiny spatial: full dim
    if hw_tile % 512 == 0:
        lane = 512
    elif hw_tile % 256 == 0:
        lane = 256
    elif hw_tile % 128 == 0:
        lane = 128
    else:
        lane = hw_tile

    n_hw = pl.cdiv(HW, hw_tile)
    ragged = (HW % hw_tile) != 0

    # Batch folding: keep steps multi-MiB for small videos, but leave >= 2 batch
    # blocks when possible so the "parallel" axis can feed both v7x TensorCores.
    per_elem_vmem = 2 * TC * hw_tile * itemsize + TC * lane * 4
    max_b = max(1, VMEM_BUDGET // per_elem_vmem)
    target_b = min(max_b, max(1, B // 2)) if B >= 2 else 1
    b_tile = _largest_divisor_leq(B, target_b)
    n_b = B // b_tile
    # TODO(synk): for B == 1 on v7x, splitting the H*W reduction across the two
    # TensorCores (pl.core_map + partial-sum combine) would recover the idle core.

    kernel = _make_kernel(hw=HW, hw_tile=hw_tile, lane=lane,
                          b_tile=b_tile, tc=TC, ragged=ragged)

    cost = pl.CostEstimate(
        flops=int(B * TC * HW + 2 * B * TC * D + 8 * B * D),
        transcendentals=int(B * D),
        bytes_accessed=int(x.size * itemsize + w_big.size * 4
                           + b_fused.size * 4 + B * D * 4),
    )

    out = pl.pallas_call(
        kernel,
        out_shape=jax.ShapeDtypeStruct((B, 1, D), jnp.float32),
        grid_spec=pltpu.PrefetchScalarGridSpec(
            num_scalar_prefetch=0,
            grid=(n_b, n_hw),
            in_specs=[
                pl.BlockSpec((b_tile, TC, hw_tile), lambda b, k: (b, 0, k)),
                pl.BlockSpec((TC, D), lambda b, k: (0, 0)),
                pl.BlockSpec((1, D), lambda b, k: (0, 0)),
            ],
            out_specs=pl.BlockSpec((b_tile, 1, D), lambda b, k: (b, 0, 0)),
            scratch_shapes=[pltpu.VMEM((b_tile, TC, lane), jnp.float32)],
        ),
        compiler_params=pltpu.CompilerParams(
            dimension_semantics=("parallel", "arbitrary"),
            vmem_limit_bytes=VMEM_LIMIT),
        cost_estimate=cost,
    )(x, w_big, b_fused)
    return out.reshape(B, D)


def reference(item_content, w_net, b_net, w_proj, b_proj):
    B, T, C, H, W = item_content.shape
    x = jnp.transpose(item_content, (0, 2, 1, 3, 4)).reshape(B, C, -1)
    pooled = jnp.mean(x.astype(jnp.float32), axis=-1)
    scoring = pooled @ w_net + b_net
    proj = scoring @ w_proj + b_proj
    return 0.5 * proj * (1.0 + lax.erf(proj / jnp.sqrt(2.0)))


if __name__ == "__main__":
    key = jax.random.PRNGKey(0)
    k_x, k_x2, k_net, k_bnet, k_proj = jax.random.split(key, 5)

    # stand-in backbone head parameters (deterministic)
    C = 3
    w_net = jax.random.normal(k_net, (C, NUM_CLASSES), dtype=jnp.float32)
    b_net = jax.random.normal(k_bnet, (NUM_CLASSES,), dtype=jnp.float32) * 0.1

    # video_proj: Linear(400, embedding_dim); xavier_normal_ weight, zero bias
    xavier_std = (2.0 / (NUM_CLASSES + EMBEDDING_DIM)) ** 0.5
    w_proj = jax.random.normal(k_proj, (NUM_CLASSES, EMBEDDING_DIM),
                               dtype=jnp.float32) * xavier_std
    b_proj = jnp.zeros((EMBEDDING_DIM,), dtype=jnp.float32)

    # 1) aligned spatial dims: exercises the chunked (fori_loop) accumulation path
    B, T, H, W = 2, 8, 32, 32
    x1 = jax.random.normal(k_x, (B, T, C, H, W), dtype=jnp.float32)
    out1 = jax.block_until_ready(c2d50_encoder(x1, w_net, b_net, w_proj, b_proj))
    ref1 = reference(x1, w_net, b_net, w_proj, b_proj)
    assert out1.shape == (B, EMBEDDING_DIM)
    assert jnp.allclose(out1, ref1, atol=1e-4, rtol=1e-4), \
        float(jnp.max(jnp.abs(out1 - ref1)))

    # 2) ragged spatial dims + batch folding: exercises multi-step accumulation,
    #    in-kernel tail masking (no host pad) and b_tile > 1
    B2, T2, H2, W2 = 4, 2, 10, 15
    x2 = jax.random.normal(k_x2, (B2, T2, C, H2, W2), dtype=jnp.float32)
    out2 = jax.block_until_ready(c2d50_encoder(x2, w_net, b_net, w_proj, b_proj))
    ref2 = reference(x2, w_net, b_net, w_proj, b_proj)
    assert out2.shape == (B2, EMBEDDING_DIM)
    assert jnp.allclose(out2, ref2, atol=1e-4, rtol=1e-4), \
        float(jnp.max(jnp.abs(out2 - ref2)))

    # 3) bf16 streaming (halves HBM bytes); accumulation stays f32 in-kernel
    x3 = x1.astype(jnp.bfloat16)
    out3 = jax.block_until_ready(c2d50_encoder(x3, w_net, b_net, w_proj, b_proj))
    ref3 = reference(x3, w_net, b_net, w_proj, b_proj)
    assert jnp.allclose(out3, ref3, atol=2e-3, rtol=2e-3), \
        float(jnp.max(jnp.abs(out3 - ref3)))

    print("KERNEL_OK")
</pallas_src>

<mosaic_0001>
module attributes {stable_mosaic.version = 11 : i64} {
  func.func @kernel(%arg0: i32, %arg1: i32, %arg2: memref<1x24x1024xf32, #tpu.memory_space<vmem>>, %arg3: memref<24x32xf32, #tpu.memory_space<vmem>>, %arg4: memref<1x32xf32, #tpu.memory_space<vmem>>, %arg5: memref<1x1x32xf32, #tpu.memory_space<vmem>>, %arg6: memref<1x24x512xf32, #tpu.memory_space<vmem>>) attributes {dimension_semantics = [#tpu.dimension_semantics<parallel>, #tpu.dimension_semantics<arbitrary>], iteration_bounds = array<i64: 2, 1>, scalar_prefetch = 0 : i64, scratch_operands = 1 : i64, tpu.core_type = #tpu.core_type<tc>, window_params = [{transform_indices = @transform_0, window_bounds = array<i64: 1, 24, 1024>}, {pipeline_mode = #tpu.pipeline_mode<synchronous>, transform_indices = @transform_1, window_bounds = array<i64: 24, 32>}, {pipeline_mode = #tpu.pipeline_mode<synchronous>, transform_indices = @transform_2, window_bounds = array<i64: 1, 32>}, {transform_indices = @transform_3, window_bounds = array<i64: 1, 1, 32>}]} {
    %c0_i32 = arith.constant 0 : i32
    %0 = arith.cmpi eq, %arg1, %c0_i32 : i32
    %1 = arith.extui %0 : i1 to i32
    %c0_i32_0 = arith.constant 0 : i32
    %2 = arith.cmpi ne, %1, %c0_i32_0 : i32
    scf.if %2 {
      %cst = arith.constant 0.000000e+00 : f32
      %20 = vector.broadcast %cst : f32 to vector<1x24x512xf32>
      %c0_20 = arith.constant 0 : index
      %c0_21 = arith.constant 0 : index
      %c0_22 = arith.constant 0 : index
      %21 = vector.load %arg6[%c0_20, %c0_21, %c0_22] : memref<1x24x512xf32, #tpu.memory_space<vmem>>, vector<1x24x512xf32>
      tpu.vector_store %arg6[%c0_20, %c0_21, %c0_22], %20 {strides = array<i32>} : memref<1x24x512xf32, #tpu.memory_space<vmem>>, vector<1x24x512xf32>,
    } else {
    }
    %c0_i32_1 = arith.constant 0 : i32
    %c512_i32 = arith.constant 512 : i32
    %3 = arith.muli %c0_i32_1, %c512_i32 : i32
    %4 = tpu.assume_multiple %3, 512 : i32
    %c0 = arith.constant 0 : index
    %c0_2 = arith.constant 0 : index
    %5 = arith.index_cast %4 : i32 to index
    %6 = vector.load %arg2[%c0, %c0_2, %5] : memref<1x24x1024xf32, #tpu.memory_space<vmem>>, vector<1x24x512xf32>
    %c0_3 = arith.constant 0 : index
    %c0_4 = arith.constant 0 : index
    %c0_5 = arith.constant 0 : index
    %7 = vector.load %arg6[%c0_3, %c0_4, %c0_5] : memref<1x24x512xf32, #tpu.memory_space<vmem>>, vector<1x24x512xf32>
    %8 = arith.addf %7, %6 : vector<1x24x512xf32>
    %c0_6 = arith.constant 0 : index
    %c0_7 = arith.constant 0 : index
    %c0_8 = arith.constant 0 : index
    %9 = vector.load %arg6[%c0_6, %c0_7, %c0_8] : memref<1x24x512xf32, #tpu.memory_space<vmem>>, vector<1x24x512xf32>
    tpu.vector_store %arg6[%c0_6, %c0_7, %c0_8], %8 {strides = array<i32>} : memref<1x24x512xf32, #tpu.memory_space<vmem>>, vector<1x24x512xf32>,
    %c1_i32 = arith.constant 1 : i32
    %c512_i32_9 = arith.constant 512 : i32
    %10 = arith.muli %c1_i32, %c512_i32_9 : i32
    %11 = tpu.assume_multiple %10, 512 : i32
    %c0_10 = arith.constant 0 : index
    %c0_11 = arith.constant 0 : index
    %12 = arith.index_cast %11 : i32 to index
    %13 = vector.load %arg2[%c0_10, %c0_11, %12] : memref<1x24x1024xf32, #tpu.memory_space<vmem>>, vector<1x24x512xf32>
    %c0_12 = arith.constant 0 : index
    %c0_13 = arith.constant 0 : index
    %c0_14 = arith.constant 0 : index
    %14 = vector.load %arg6[%c0_12, %c0_13, %c0_14] : memref<1x24x512xf32, #tpu.memory_space<vmem>>, vector<1x24x512xf32>
    %15 = arith.addf %14, %13 : vector<1x24x512xf32>
    %c0_15 = arith.constant 0 : index
    %c0_16 = arith.constant 0 : index
    %c0_17 = arith.constant 0 : index
    %16 = vector.load %arg6[%c0_15, %c0_16, %c0_17] : memref<1x24x512xf32, #tpu.memory_space<vmem>>, vector<1x24x512xf32>
    tpu.vector_store %arg6[%c0_15, %c0_16, %c0_17], %15 {strides = array<i32>} : memref<1x24x512xf32, #tpu.memory_space<vmem>>, vector<1x24x512xf32>,
    %c2_i32 = arith.constant 2 : i32
    %c0_i32_18 = arith.constant 0 : i32
    %17 = arith.cmpi eq, %arg1, %c0_i32_18 : i32
    %18 = arith.extui %17 : i1 to i32
    %c0_i32_19 = arith.constant 0 : i32
    %19 = arith.cmpi ne, %18, %c0_i32_19 : i32
    scf.if %19 {
      %c0_20 = arith.constant 0 : index
      %c0_21 = arith.constant 0 : index
      %c0_22 = arith.constant 0 : index
      %20 = vector.load %arg6[%c0_20, %c0_21, %c0_22] : memref<1x24x512xf32, #tpu.memory_space<vmem>>, vector<1x24x512xf32>
      %cst = arith.constant dense<0.000000e+00> : vector<1x24xf32>
      %21 = vector.multi_reduction <add>, %20, %cst [2] : vector<1x24x512xf32> to vector<1x24xf32>
      %c0_23 = arith.constant 0 : index
      %c0_24 = arith.constant 0 : index
      %22 = vector.load %arg3[%c0_23, %c0_24] : memref<24x32xf32, #tpu.memory_space<vmem>>, vector<24x32xf32>
      %cst_25 = arith.constant dense<0.000000e+00> : vector<1x32xf32>
      %23 = tpu.matmul %21, %22, %cst_25 {dimension_numbers = #tpu.dot_dimension_numbers<[1], [0], [0], [1], [0, 0, 1, 1], [], []>} : vector<1x24xf32>, vector<24x32xf32>, vector<1x32xf32> -> vector<1x32xf32>
      %c0_26 = arith.constant 0 : index
      %c0_27 = arith.constant 0 : index
      %24 = vector.load %arg4[%c0_26, %c0_27] : memref<1x32xf32, #tpu.memory_space<vmem>>, vector<1x32xf32>
      %25 = arith.addf %23, %24 : vector<1x32xf32>
      %cst_28 = arith.constant 5.000000e-01 : f32
      %26 = vector.broadcast %cst_28 : f32 to vector<1x32xf32>
      %27 = arith.mulf %26, %25 : vector<1x32xf32>
      %cst_29 = arith.constant 0.707106769 : f32
      %28 = vector.broadcast %cst_29 : f32 to vector<1x32xf32>
      %29 = arith.mulf %25, %28 : vector<1x32xf32>
      %30 = math.erf %29 : vector<1x32xf32>
      %cst_30 = arith.constant 1.000000e+00 : f32
      %31 = vector.broadcast %cst_30 : f32 to vector<1x32xf32>
      %32 = arith.addf %31, %30 : vector<1x32xf32>
      %33 = arith.mulf %27, %32 : vector<1x32xf32>
      %34 = vector.shape_cast %33 : vector<1x32xf32> to vector<1x1x32xf32>
      %c0_31 = arith.constant 0 : index
      %c0_32 = arith.constant 0 : index
      %c0_33 = arith.constant 0 : index
      %35 = vector.load %arg5[%c0_31, %c0_32, %c0_33] : memref<1x1x32xf32, #tpu.memory_space<vmem>>, vector<1x1x32xf32>
      tpu.vector_store %arg5[%c0_31, %c0_32, %c0_33], %34 {strides = array<i32>} : memref<1x1x32xf32, #tpu.memory_space<vmem>>, vector<1x1x32xf32>,
    } else {
    }
    return
  }
  func.func @transform_0(%arg0: i32, %arg1: i32) -> (i32, i32, i32) {
    %c0_i32 = arith.constant 0 : i32
    %c0_i32_0 = arith.constant 0 : i32
    return %arg0, %c0_i32, %arg1 : i32, i32, i32
  }
  func.func @transform_1(%arg0: i32, %arg1: i32) -> (i32, i32) {
    %c0_i32 = arith.constant 0 : i32
    %c0_i32_0 = arith.constant 0 : i32
    %c0_i32_1 = arith.constant 0 : i32
    return %c0_i32, %c0_i32_0 : i32, i32
  }
  func.func @transform_2(%arg0: i32, %arg1: i32) -> (i32, i32) {
    %c0_i32 = arith.constant 0 : i32
    %c0_i32_0 = arith.constant 0 : i32
    %c0_i32_1 = arith.constant 0 : i32
    return %c0_i32, %c0_i32_0 : i32, i32
  }
  func.func @transform_3(%arg0: i32, %arg1: i32) -> (i32, i32, i32) {
    %c0_i32 = arith.constant 0 : i32
    %c0_i32_0 = arith.constant 0 : i32
    %c0_i32_1 = arith.constant 0 : i32
    return %arg0, %c0_i32, %c0_i32_0 : i32, i32, i32
  }
}

</mosaic_0001>

<bundles_post_ra>
// kernel: tpu_custom_call.1
= control target key start
LH: loop header
LB: loop body
LE: loop exit
PB: predicated region body
PF: predicated region fallthrough
CT: control target
= control target key end

     0   :  { %8 = vsyncpa [#allocation4], 0  ;;  %s1051_s0 = inlined_call_operand.hbm [shape: f32[2,24,1024], index: 0, kind: input, shape index: {}]   ;;  %s1052_s1 = inlined_call_operand.hbm [shape: f32[24,32], index: 1, kind: input, shape index: {}]   ;;  %s1053_s2 = inlined_call_operand.vmem [shape: f32[1,32], index: 2, kind: input, shape index: {}]   ;;  %s1054_s3 = inlined_call_operand.hbm [shape: f32[2,1,32], index: 3, kind: output, shape index: {}]  }
   0x1   :  { %10 = vsyncpa [#allocation4 + $0x1], 0 }
   0x2   :  { %11 = vsyncpa [#allocation7], 0 }
   0x3   :  { %12 = vsyncpa [#allocation5], 0 }
   0x4   :  { %14 = vsyncpa [#allocation5 + $0x1], 0  ;;  %s860_s12 = smov 0   ;;  %s862_s13 = smov 0  }
   0x5   :  { %s864_s14 = smov 0   ;;  %s866_s15 = smov 0  }
   0x6   :  { %s868_s16 = smov 0   ;;  %s870_s17 = smov 0  }
   0x7 LB: > { %s570_s18 = sadd.s32 4294967295, %s829_s17   ;;  %s571_s19 = sadd.s32 4294967294, %s829_s17   ;;  %s829_s17 = sphi %s870_s17, %s20_s17   ;;  %s825_s16 = sphi %s868_s16, %s1070_s16   ;;  %s821_s15 = sphi %s866_s15, %s1069_s15   ;;  %s817_s14 = sphi %s864_s14, %s1068_s14   ;;  %s813_s13 = sphi %s862_s13, %s1067_s13   ;;  %s809_s12 = sphi %s860_s12, %s1066_s12  }
   0x8   : > { %p54_p0 = scmp.ne.s32.totalorder %s813_s13, %s809_s12  ;;  %p894_p1 = scmp.eq.s32.totalorder %s570_s18, 0 }
   0x9   : > { %p898_p2 = scmp.eq.s32.totalorder %s570_s18, 1  ;;  %p126_p3 = scmp.eq.s32.totalorder %s571_s19, 1 }
   0xa   : > { %p904_p4 = por %p894_p1, %p54_p0  ;;  %p572_p5 = scmp.ge.s32.totalorder %s829_s17, 1 }
   0xb   : > { %p909_p6 = por %p126_p3, %p54_p0  ;;  %p133_p7 = scmp.lt.s32.totalorder %s829_s17, 3 }
   0xc   : > { %s1058_s22 = scalar_select %p904_p4, 1, 0 }
   0xd   : > { %s1059_s23 = scalar_select %p909_p6, 1, 0 }
   0xe   : > { %p914_p8 = pnand %p572_p5, %p133_p7  ;;  %s831_s25 = smov [#allocation6]  }
   0xf   : > { %s145_s26 = sshll.u32 %s831_s25, 4  ;;  %p574_p10 = scmp.ge.s32.totalorder %s829_s17, 2  ;;  %s146_s26 = int_to_ptr.vmem [resolvable:$true] %s145_s26 }
  0x10   : > { %p618_p9 = pneg %p914_p8  ;;  %s32_s28 = sadd.s32 1, %s825_s16 }
  0x11   : > { %s702_s29 = scalar_lea.vmem %s146_s26, 384  ;;  %p710_p5 = scmp.lt.s32.totalorder %s146_s26, %s146_s26 }
  0x12   : > { %p923_p11 = pnand %p618_p9, %p894_p1  ;;  %p703_p13 = scmp.ne.s32.totalorder %s146_s26, %s702_s29 }
  0x13   : > { %p711_p7 = scmp.lt.s32.totalorder %s702_s29, %s702_s29 }
  0x14   : > { %p693_p12 = pneg %p923_p11 }
  0x15   : > { %p712_p6 = por %p711_p7, %p710_p5 }
  0x16   : > { %p705_p0 = pnand %p703_p13, %p693_p12 }
  0x18   : > { %p706_p3 = pneg %p705_p0 }
  0x1a   : > { %p713_p4 = pnand %p712_p6, %p706_p3 }
  0x1c   : > { %716 = shalt.err (!%p713_p4)
}
  0x1d   : > { %s832_s30 = smov 128   ;;  %s833_s4 = smov 8  }
  0x1e   : > { %621 = dma.hbm_to_vmem [thread:$0]  (!%p923_p11), %s1052_s1, 384, %s146_s26, [#allocation7], %s832_s30, %s832_s30, %s833_s4  }
  0x1f   : > { %p34_p6 = scmp.ge.s32.totalorder %s32_s28, 2  ;;  %s41_s7 = sadd.s32 1, %s817_s14 }
  0x20   : > { %p48_p4 = scmp.ne.s32.totalorder %s817_s14, %s813_s13  ;;  %p49_p9 = scmp.eq.s32.totalorder %s829_s17, 0 }
  0x21   : > { %s1072_s28 = smov (%p34_p6, %s32_s28), 0  ;;  %p631_p0 = scmp.lt.s32.totalorder %s829_s17, 2 }
  0x22   : > { %p50_p12 = por %p49_p9, %p48_p4  ;;  %p943_p13 = por %p898_p2, %p48_p4 }
  0x23   : > { %s36_s9 = ssub.s32 %s825_s16, %s1072_s28  ;;  %s162_s10 = sand.u32 1, %s817_s14  }
  0x24   : > { %p39_p3 = scmp.eq.s32.totalorder %s36_s9, 0  ;;  %s607_s11 = smul.u32 192, %s162_s10 }
  0x25   : > { %s608_s19 = smul.u32 3072, %s825_s16  ;;  %p955_p11 = pnand %p631_p0, %p50_p12 }
  0x26   : > { %s952_s18 = scalar_select %p39_p3, %s817_s14, %s41_s7  }
  0x27   : > { %s166_s25 = scalar_lea.vmem [#allocation3], %s607_s11  ;;  %s174_s30 = scalar_lea.hbm %s1051_s0, %s608_s19 }
  0x28   : > { %s175_s26 = sshll.u32 %s166_s25, 4  ;;  %s163_s4 = scalar_lea.sflag [#allocation4], %s162_s10  ;;  %s176_s26 = int_to_ptr.vmem [resolvable:$true] %s175_s26 }
  0x29   : > { %p719_p2 = pneg %p955_p11  ;;  %s730_s5 = scalar_lea.vmem %s176_s26, 3072 }
  0x2a   : > { %p731_p5 = scmp.ne.s32.totalorder %s176_s26, %s730_s5  ;;  %s834_s6 = smov [#allocation3]  }
  0x2b   : > { %s735_s7 = sshll.u32 %s834_s6, 4  ;;  %s736_s7 = int_to_ptr.vmem [resolvable:$false] %s735_s7 }
  0x2c   : > { %p733_p7 = pnand %p731_p5, %p719_p2  ;;  %s737_s9 = scalar_lea.vmem %s736_s7, 6144 }
  0x2d   : > { %p738_p4 = scmp.lt.s32.totalorder %s176_s26, %s736_s7  ;;  %p739_p9 = scmp.lt.s32.totalorder %s737_s9, %s730_s5 }
  0x2e   : > { %p734_p6 = pneg %p733_p7 }
  0x2f   : > { %p740_p12 = por %p739_p9, %p738_p4 }
  0x31   : > { %p741_p0 = pnand %p740_p12, %p734_p6 }
  0x33   : > { %744 = shalt.err (!%p741_p0)
}
  0x34   : > { %s835_s11 = smov 1024   ;;  %s836_s19 = smov 64  }
  0x35   : > { %625 = dma.hbm_to_vmem [thread:$0]  (!%p955_p11), %s174_s30, 3072, %s176_s26, %s163_s4, %s835_s11, %s835_s11, %s836_s19  }
  0x36   : > { %187 = sbr.rel (%p914_p8) target bundleno = 447 (0x1bf), region = 32  ;;  %s969_s10 = sand.u32 (!%p914_p8), 1, %s813_s13  }
  0x37   : > { %s609_s25 = smul.u32 (!%p914_p8), 192, %s969_s10  ;;  %s190_s29 = scalar_lea.sflag (!%p914_p8), [#allocation4], %s969_s10 }
  0x38   : > { %p1064_p3 = scmp.ne.s32.totalorder (!%p914_p8), %s1058_s22, 0 }
  0x39   : > { %s973_s21 = scalar_lea.vmem (!%p914_p8), [#allocation3], %s609_s25 }
  0x3b   : > { %796 = dma.done.wait (%p1064_p3), %s190_s29, 3072  }
  0x3c   : > { %798 = vsyncadd (%p1064_p3), %s190_s29, 4294964224 }
  0x3d   : > { %800 = dma.done.wait (%p894_p1), [#allocation7], 384  }
  0x3e   : > { %802 = vsyncadd (%p894_p1), [#allocation7], 4294966912  ;;  %v236_v0 = vld [vmem:[%s973_s21] sm:$0xff]  ;;  %v237_v1 = vld [vmem:[%s973_s21 + $0x8] sm:$0xff]  ;;  %v837_v46 = vmov 0.0   ;;  %vm838_vm0 = vmmov 0   ;;  %v370_v49 = vlaneseq }
  0x3f   : > { %v238_v2 = vld [vmem:[%s973_s21 + $0x10] sm:$0xff]  ;;  %v239_v3 = vld [vmem:[%s973_s21 + $0x18] sm:$0xff]  ;;  %v578_v4 = vld [vmem:[%s973_s21 + $0x20] sm:$0xff]  ;;  %598 = vmatprep.subr.mxu0 %v837_v46  ;;  %604 = vmatprep.mubr.msk.f32.mxu0 %vm838_vm0, %v837_v46  ;;  %vm381_vm1 = vcmask 130112   ;;  %vm388_vm2 = vcmask 195712   ;;  %vm390_vm3 = vcmask 195584  }
  0x40   : > { %v579_v5 = vld [vmem:[%s973_s21 + $0x28] sm:$0xff]  ;;  %v580_v6 = vld [vmem:[%s973_s21 + $0x30] sm:$0xff]  ;;  %v581_v7 = vld [vmem:[%s973_s21 + $0x38] sm:$0xff]  ;;  %v309_v8 = vadd.f32 %v578_v4, %v236_v0  ;;  %v371_v50 = vand.u32 127, %v370_v49  ;;  %v373_v51 = vshrl.u32 %v370_v49, 7  ;;  %s591_s24 = sshll.u32 %s821_s15, 4 }
  0x41   : > { %v310_v9 = vadd.f32 %v579_v5, %v237_v1  ;;  %v240_v10 = vld [vmem:[%s973_s21 + $0x40] sm:$0xff]  ;;  %v311_v11 = vadd.f32 %v580_v6, %v238_v2  ;;  %v241_v12 = vld [vmem:[%s973_s21 + $0x48] sm:$0xff]  ;;  %v242_v13 = vld [vmem:[%s973_s21 + $0x50] sm:$0xff]  ;;  %v312_v15 = vadd.f32 %v581_v7, %v239_v3  ;;  %s218_s26 = scalar_lea.vmem [#allocation8], %s969_s10  ;;  %vm468_vm4 = vcmask 253952   ;;  %s481_s5 = scalar_lea.hbm %s1054_s3, %s591_s24 }
  0x42   : > { %v243_v14 = vld [vmem:[%s973_s21 + $0x58] sm:$0xff]  ;;  %v582_v17 = vld [vmem:[%s973_s21 + $0x60] sm:$0xff]  ;;  %v583_v18 = vld [vmem:[%s973_s21 + $0x68] sm:$0xff]  ;;  %v376_v52 = vadd.s32 4294967288, %v371_v50  ;;  %v383_v53 = vadd.s32 4294967280, %v371_v50  ;;  %v374_v55 = vsub.s32 %v371_v50, %v373_v51  ;;  %s483_s27 = sshll.u32 %s218_s26, 4  ;;  %s484_s27 = int_to_ptr.vmem [resolvable:$true] %s483_s27 }
  0x43   : > { %v348_v16 = vadd.f32 %v310_v9, %v309_v8  ;;  %v584_v19 = vld [vmem:[%s973_s21 + $0x70] sm:$0xff]  ;;  %v585_v20 = vld [vmem:[%s973_s21 + $0x78] sm:$0xff]  ;;  %v313_v21 = vadd.f32 %v582_v17, %v240_v10  ;;  %v314_v22 = vadd.f32 %v583_v18, %v241_v12  ;;  %v244_v24 = vld [vmem:[%s973_s21 + $0x80] sm:$0xff]  ;;  %s471_s6 = scalar_lea.sflag [#allocation5], %s969_s10  ;;  %s745_s7 = scalar_lea.vmem %s484_s27, 16 }
  0x44   : > { %v315_v23 = vadd.f32 %v584_v19, %v242_v13  ;;  %v245_v25 = vld [vmem:[%s973_s21 + $0x88] sm:$0xff]  ;;  %v246_v27 = vld [vmem:[%s973_s21 + $0x90] sm:$0xff]  ;;  %v247_v28 = vld [vmem:[%s973_s21 + $0x98] sm:$0xff]  ;;  %v316_v30 = vadd.f32 %v585_v20, %v243_v14  ;;  %v379_v56 = vsub.s32 %v376_v52, %v373_v51  ;;  %v386_v57 = vsub.s32 %v383_v53, %v373_v51  ;;  %p746_p1 = scmp.ne.s32.totalorder %s484_s27, %s745_s7  ;;  %s839_s9 = smov [#allocation8]  }
  0x45   : > { %v349_v26 = vadd.f32 %v348_v16, %v311_v11  ;;  %v586_v29 = vld [vmem:[%s973_s21 + $0xa0] sm:$0xff]  ;;  %v353_v31 = vadd.f32 %v314_v22, %v313_v21  ;;  %v587_v32 = vld [vmem:[%s973_s21 + $0xa8] sm:$0xff]  ;;  %v588_v33 = vld [vmem:[%s973_s21 + $0xb0] sm:$0xff]  ;;  %s749_s15 = sshll.u32 %s839_s9, 4  ;;  %s750_s15 = int_to_ptr.vmem [resolvable:$false] %s749_s15 }
  0x46   : > { %v589_v34 = vld [vmem:[%s973_s21 + $0xb8] sm:$0xff]  ;;  %v317_v35 = vadd.f32 %v586_v29, %v244_v24  ;;  %v318_v37 = vadd.f32 %v587_v32, %v245_v25  ;;  %v319_v38 = vadd.f32 %v588_v33, %v246_v27  ;;  %v365_v45 = vld [vmem:[#allocation6 + $0x10] sm:$0xff]  ;;  %v364_v47 = vld [vmem:[#allocation6 + $0x8] sm:$0xff]  ;;  %p747_p8 = pnand %p746_p1, %p943_p13  ;;  %s751_s11 = scalar_lea.vmem %s750_s15, 32 }
  0x47   : > { %v350_v36 = vadd.f32 %v349_v26, %v312_v15  ;;  %v354_v39 = vadd.f32 %v353_v31, %v315_v23  ;;  %v320_v40 = vadd.f32 %v589_v34, %v247_v28  ;;  %599 = vmatpush3.msra.mxu0 %v365_v45  ;;  %v363_v48 = vld [vmem:[#allocation6] sm:$0xff]  ;;  %p752_p2 = scmp.lt.s32.totalorder %s484_s27, %s750_s15  ;;  %p753_p5 = scmp.lt.s32.totalorder %s751_s11, %s745_s7 }
  0x48   : > { %v358_v41 = vadd.f32 %v318_v37, %v317_v35  ;;  %600 = vmatprep.subr.mxu0 %v837_v46  ;;  %v366_v1 = vld [vmem:[%s1053_s2] sm:$0x1]  ;;  %p748_p11 = pneg %p747_p8 }
  0x49   : > { %351 = vadd.xlane.f32.xlu0 %v350_v36  ;;  %v355_v42 = vadd.f32 %v354_v39, %v316_v30  ;;  %601 = vmatpush3.msra.mxu0 %v364_v47  ;;  %p754_p7 = por %p753_p5, %p752_p2 }
  0x4a   : > { %v359_v43 = vadd.f32 %v358_v41, %v319_v38  ;;  %602 = vmatprep.subr.mxu0 %v837_v46 }
  0x4b   : > { %603 = vmatpush3.msra.mxu0 %v363_v48  ;;  %p755_p6 = pnand %p754_p7, %p748_p11 }
  0x4c   : > { %v360_v44 = vadd.f32 %v359_v43, %v320_v40 }
  0x4d   : > { %356 = vadd.xlane.f32.xlu0 %v355_v42 }
  0x4e   : > { %361 = vadd.xlane.f32.xlu1 %v360_v44 }
  0xd2   : > { %v352_v54 = vpop.xlane.xlu0 %351 }
  0xd3   : > { %v375_v59 = vrot.slane %v352_v54, %v374_v55 }
  0xd6   : > { %v357_v58 = vpop.xlane.xlu0 %356 }
  0xd7   : > { %v380_v60 = vrot.slane %v357_v58, %v379_v56  ;;  %v362_v61 = vpop.xlane.xlu1 %361 }
  0xd8   : > { %v387_v63 = vrot.slane %v362_v61, %v386_v57 }
  0xd9   : > { %v382_v62 = vsel %vm381_vm1, %v380_v60, %v375_v59 }
  0xda   : > { %v389_v0 = vsel %vm388_vm2, %v387_v63, %v382_v62 }
  0xdb   : > { %605 = vmatmul.mubr.msk.f32.vlgmr.msra.gmra.mxu0 %vm390_vm3, %v389_v0 }
 0x19b   : > { %v459_v2 = vpop.f32.mrf.mxu0 }
 0x19c   : > { %v460_v3 = vadd.f32 %v459_v2, %v366_v1 }
 0x19d   : > { %v606_v4 = vpop.f32.mrf.mxu0 }
 0x19e   : > { %v464_v5 = vmul.f32 0.70710677, %v460_v3  ;;  %v463_v7 = vmul.f32 0.5, %v460_v3 }
 0x1a0   : > { %689 = verf.f32 %v464_v5 }
 0x1ad   : > { %v690_v6 = vpop.eup %689 }
 0x1ae   : > { %v466_v8 = vadd.f32 1.0, %v690_v6 }
 0x1b0   : > { %v467_v9 = vmul.f32 %v466_v8, %v463_v7 }
 0x1b2   : > { %469 = vst.msk [vmem:[%s218_s26] sm:$0x1] %vm468_vm4, %v467_v9 }
 0x1b3   : > { %758 = shalt.err (!%p755_p6)
}
 0x1b4   : > { %s759_s19 = scalar_lea.hbm %s481_s5, 16  ;;  %s763_s29 = scalar_lea.hbm %s1054_s3, 32 }
 0x1b5   : > { %p760_p4 = scmp.ne.s32.totalorder %s481_s5, %s759_s19  ;;  %p764_p0 = scmp.lt.s32.totalorder %s481_s5, %s1054_s3 }
 0x1b6   : > { %p765_p3 = scmp.lt.s32.totalorder %s763_s29, %s759_s19 }
 0x1b7   : > { %p761_p9 = pnand %p760_p4, %p943_p13 }
 0x1b8   : > { %p766_p1 = por %p765_p3, %p764_p0 }
 0x1b9   : > { %p762_p12 = pneg %p761_p9 }
 0x1bb   : > { %p767_p8 = pnand %p766_p1, %p762_p12 }
 0x1bd   : > { %770 = shalt.err (!%p767_p8)
}
 0x1be   : > { %616 = dma.vmem_to_hbm [thread:$0]  (%p943_p13), %s484_s27, 16, %s481_s5, %s471_s6  }
 0x1bf PF: > { %s495_s22 = sand.u32 1, %s809_s12   ;;  %p1065_p11 = scmp.ne.s32.totalorder %s1059_s23, 0 }
 0x1c0   : > { %s496_s24 = scalar_lea.sflag [#allocation5], %s495_s22 }
 0x1c1   : > { %p627_p2 = pnand %p574_p10, %p1065_p11 }
 0x1c3   : > { %p628_p5 = pneg %p627_p2 }
 0x1c5   : > { %804 = dma.done.wait (%p628_p5), %s496_s24, 16  }
 0x1c6   : > { %806 = vsyncadd (%p628_p5), %s496_s24, 4294967280  ;;  %s20_s17 = sadd.s32 1, %s829_s17   ;;  %s1066_s12 = smov %s813_s13 }
 0x1c7   : > { %p17_p7 = scmp.ge.s32.totalorder %s20_s17, 4   ;;  %s1067_s13 = smov %s817_s14 }
 0x1c8   : > { %s1068_s14 = smov %s952_s18  ;;  %s1069_s15 = smov %s825_s16 }
 0x1c9   : > { %s1070_s16 = smov %s1072_s28  ;;  %19 = sbr.rel (!%p17_p7) target bundleno = 7 (0x7), region = 90 }
 0x1ce   :  { %500 = vsyncpa [#allocation4], 1 }
 0x1cf   :  { %502 = vsyncpa [#allocation4 + $0x1], 1 }
 0x1d0   :  { %503 = vsyncpa [#allocation7], 1 }
 0x1d1   :  { %504 = vsyncpa [#allocation5], 1 }
 0x1d2   :  { %506 = vsyncpa [#allocation5 + $0x1], 1 }

</bundles_post_ra>
